<compile_context>
chip_gen: v7x
topology: tpu7x:2x2x1
jax: 0.10.0
libtpu: 0.0.40
codegen_flags: <defaults>
</compile_context>

<pallas_src>
import functools

import jax
import jax.numpy as jnp
from jax.experimental import pallas as pl
from jax.experimental.pallas import tpu as pltpu


EPS = 1e-6


def _round_up(a: int, b: int) -> int:
    return (a + b - 1) // b * b


def _layernorm_kernel(x_ref, alpha_ref, bias_ref, o_ref, *, n_valid: int):
    # x_ref: (TR, F_pad); alpha_ref/bias_ref: (1, F_pad); o_ref: (TR, F_pad)
    x = x_ref[...].astype(jnp.float32)
    f_pad = x.shape[-1]

    if n_valid != f_pad:
        lane = jax.lax.broadcasted_iota(jnp.int32, x.shape, dimension=x.ndim - 1)
        valid = lane < n_valid
        x = jnp.where(valid, x, 0.0)
    else:
        valid = None

    inv_n = jnp.float32(1.0 / n_valid)
    mean = jnp.sum(x, axis=-1, keepdims=True) * inv_n
    d = x - mean
    if valid is not None:
        # padded lanes must not contribute to the variance sum
        d = jnp.where(valid, d, 0.0)

    # unbiased std, matching torch.Tensor.std default (ddof=1)
    var = jnp.sum(d * d, axis=-1, keepdims=True) * jnp.float32(1.0 / (n_valid - 1))
    std = jnp.sqrt(var)

    # divide -> reciprocal (EUP slot) + multiply (VPU); exact reciprocal to
    # preserve the 1e-5 comparison tolerance against the PyTorch semantics.
    inv = pl.reciprocal(std + jnp.float32(EPS), approx=False)

    alpha = alpha_ref[...].astype(jnp.float32)
    bias = bias_ref[...].astype(jnp.float32)
    y = alpha * (d * inv) + bias
    o_ref[...] = y.astype(o_ref.dtype)


def encoder_forward(x, mask, alpha, bias, *, row_tile: int = 512):
    """Encoder forward: (empty external layer stack) -> LayerNorm(features).

    x:     [B, S, F]
    mask:  unused here (would be consumed by the external attention layers)
    alpha: [F]
    bias:  [F]
    """
    # TODO(synk): `self.layers` is an externally-provided ModuleList (e.g.
    # Longformer encoder blocks); it is treated as empty here, so `mask` is
    # accepted but unused.
    del mask

    B, S, F = x.shape
    assert F > 1, "unbiased std (ddof=1) requires F > 1"
    rows = B * S

    # Sublane packing: 8 rows for 32-bit dtypes, 16 for 16-bit dtypes.
    sub = 8 if jnp.dtype(x.dtype).itemsize >= 4 else 16

    # Lane-dense feature axis.
    F_pad = _round_up(F, 128)

    # Row tile: largest of {row_tile, rows} rounded to the sublane packing,
    # then pad rows so the grid divides evenly.
    TR = min(_round_up(row_tile, sub), _round_up(rows, sub))
    rows_pad = _round_up(rows, TR)
    grid = (rows_pad // TR,)

    x2d = x.reshape(rows, F)
    if rows_pad != rows or F_pad != F:
        x2d = jnp.pad(x2d, ((0, rows_pad - rows), (0, F_pad - F)))
    alpha2d = alpha.reshape(1, F)
    bias2d = bias.reshape(1, F)
    if F_pad != F:
        alpha2d = jnp.pad(alpha2d, ((0, 0), (0, F_pad - F)))
        bias2d = jnp.pad(bias2d, ((0, 0), (0, F_pad - F)))

    kernel = functools.partial(_layernorm_kernel, n_valid=F)

    out2d = pl.pallas_call(
        kernel,
        out_shape=jax.ShapeDtypeStruct((rows_pad, F_pad), x.dtype),
        grid_spec=pltpu.PrefetchScalarGridSpec(
            num_scalar_prefetch=0,
            grid=grid,
            in_specs=[
                pl.BlockSpec((TR, F_pad), lambda i: (i, 0)),
                pl.BlockSpec((1, F_pad), lambda i: (0, 0)),
                pl.BlockSpec((1, F_pad), lambda i: (0, 0)),
            ],
            out_specs=pl.BlockSpec((TR, F_pad), lambda i: (i, 0)),
        ),
        compiler_params=pltpu.CompilerParams(
            # rows are fully independent -> shard across TensorCores on v7x
            dimension_semantics=("parallel",),
        ),
    )(x2d, alpha2d, bias2d)

    return out2d[:rows, :F].reshape(B, S, F)


def _reference(x, alpha, bias):
    mean = jnp.mean(x, axis=-1, keepdims=True)
    var = jnp.var(x, axis=-1, keepdims=True, ddof=1)
    std = jnp.sqrt(var)
    return alpha * (x - mean) / (std + EPS) + bias


if __name__ == "__main__":
    key = jax.random.PRNGKey(0)
    B, S, F = 2, 8, 32

    kx, _ = jax.random.split(key)
    x = jax.random.normal(kx, (B, S, F), dtype=jnp.float32)
    mask = jnp.ones((B, 1, 1, S), dtype=jnp.float32)  # attention-style mask (unused)

    # Deterministic parameter init, matching nn.Parameter(torch.ones/zeros(features))
    alpha = jnp.ones((F,), dtype=jnp.float32)
    bias = jnp.zeros((F,), dtype=jnp.float32)

    out = encoder_forward(x, mask, alpha, bias)
    out = jax.block_until_ready(out)

    ref = _reference(x, alpha, bias)
    assert out.shape == (B, S, F)
    assert jnp.allclose(out, ref, atol=1e-5, rtol=1e-5), float(
        jnp.max(jnp.abs(out - ref))
    )

    print("KERNEL_OK")
</pallas_src>

<mosaic_0001>
module attributes {stable_mosaic.version = 11 : i64} {
  func.func @_layernorm_kernel(%arg0: i32, %arg1: memref<16x128xf32, #tpu.memory_space<vmem>>, %arg2: memref<1x128xf32, #tpu.memory_space<vmem>>, %arg3: memref<1x128xf32, #tpu.memory_space<vmem>>, %arg4: memref<16x128xf32, #tpu.memory_space<vmem>>) attributes {dimension_semantics = [#tpu.dimension_semantics<parallel>], iteration_bounds = array<i64: 1>, scalar_prefetch = 0 : i64, scratch_operands = 0 : i64, tpu.core_type = #tpu.core_type<tc>, window_params = [{transform_indices = @transform_0, window_bounds = array<i64: 16, 128>}, {pipeline_mode = #tpu.pipeline_mode<synchronous>, transform_indices = @transform_1, window_bounds = array<i64: 1, 128>}, {pipeline_mode = #tpu.pipeline_mode<synchronous>, transform_indices = @transform_2, window_bounds = array<i64: 1, 128>}, {transform_indices = @transform_3, window_bounds = array<i64: 16, 128>}]} {
    %c0 = arith.constant 0 : index
    %c0_0 = arith.constant 0 : index
    %0 = vector.load %arg1[%c0, %c0_0] : memref<16x128xf32, #tpu.memory_space<vmem>>, vector<16x128xf32>
    %1 = tpu.iota {dimensions = array<i32: 1>} : vector<16x128xi32>
    %c32_i32 = arith.constant 32 : i32
    %2 = vector.broadcast %c32_i32 : i32 to vector<16x128xi32>
    %3 = arith.cmpi slt, %1, %2 : vector<16x128xi32>
    %cst = arith.constant 0.000000e+00 : f32
    %4 = vector.broadcast %cst : f32 to vector<16x128xf32>
    %5 = arith.select %3, %0, %4 : vector<16x128xi1>, vector<16x128xf32>
    %cst_1 = arith.constant dense<0.000000e+00> : vector<16xf32>
    %6 = vector.multi_reduction <add>, %5, %cst_1 [1] : vector<16x128xf32> to vector<16xf32>
    %7 = vector.shape_cast %6 : vector<16xf32> to vector<16x1xf32>
    %cst_2 = arith.constant 3.125000e-02 : f32
    %8 = vector.broadcast %cst_2 : f32 to vector<16x1xf32>
    %9 = arith.mulf %7, %8 : vector<16x1xf32>
    %10 = vector.broadcast %9 : vector<16x1xf32> to vector<16x128xf32>
    %11 = arith.subf %5, %10 : vector<16x128xf32>
    %cst_3 = arith.constant 0.000000e+00 : f32
    %12 = vector.broadcast %cst_3 : f32 to vector<16x128xf32>
    %13 = arith.select %3, %11, %12 : vector<16x128xi1>, vector<16x128xf32>
    %14 = arith.mulf %13, %13 : vector<16x128xf32>
    %cst_4 = arith.constant dense<0.000000e+00> : vector<16xf32>
    %15 = vector.multi_reduction <add>, %14, %cst_4 [1] : vector<16x128xf32> to vector<16xf32>
    %16 = vector.shape_cast %15 : vector<16xf32> to vector<16x1xf32>
    %cst_5 = arith.constant 0.0322580636 : f32
    %17 = vector.broadcast %cst_5 : f32 to vector<16x1xf32>
    %18 = arith.mulf %16, %17 : vector<16x1xf32>
    %19 = math.sqrt %18 : vector<16x1xf32>
    %cst_6 = arith.constant 9.99999997E-7 : f32
    %20 = vector.broadcast %cst_6 : f32 to vector<16x1xf32>
    %21 = arith.addf %19, %20 : vector<16x1xf32>
    %22 = tpu.reciprocal %21 : vector<16x1xf32> -> vector<16x1xf32>
    %c0_7 = arith.constant 0 : index
    %c0_8 = arith.constant 0 : index
    %23 = vector.load %arg2[%c0_7, %c0_8] : memref<1x128xf32, #tpu.memory_space<vmem>>, vector<1x128xf32>
    %c0_9 = arith.constant 0 : index
    %c0_10 = arith.constant 0 : index
    %24 = vector.load %arg3[%c0_9, %c0_10] : memref<1x128xf32, #tpu.memory_space<vmem>>, vector<1x128xf32>
    %25 = vector.broadcast %22 : vector<16x1xf32> to vector<16x128xf32>
    %26 = arith.mulf %13, %25 : vector<16x128xf32>
    %27 = vector.broadcast %23 : vector<1x128xf32> to vector<16x128xf32>
    %28 = arith.mulf %27, %26 : vector<16x128xf32>
    %29 = vector.broadcast %24 : vector<1x128xf32> to vector<16x128xf32>
    %30 = arith.addf %28, %29 : vector<16x128xf32>
    %c0_11 = arith.constant 0 : index
    %c0_12 = arith.constant 0 : index
    %31 = vector.load %arg4[%c0_11, %c0_12] : memref<16x128xf32, #tpu.memory_space<vmem>>, vector<16x128xf32>
    tpu.vector_store %arg4[%c0_11, %c0_12], %30 {strides = array<i32>} : memref<16x128xf32, #tpu.memory_space<vmem>>, vector<16x128xf32>,
    return
  }
  func.func @transform_0(%arg0: i32) -> (i32, i32) {
    %c0_i32 = arith.constant 0 : i32
    %c0_i32_0 = arith.constant 0 : i32
    return %arg0, %c0_i32 : i32, i32
  }
  func.func @transform_1(%arg0: i32) -> (i32, i32) {
    %c0_i32 = arith.constant 0 : i32
    %c0_i32_0 = arith.constant 0 : i32
    %c0_i32_1 = arith.constant 0 : i32
    return %c0_i32, %c0_i32_0 : i32, i32
  }
  func.func @transform_2(%arg0: i32) -> (i32, i32) {
    %c0_i32 = arith.constant 0 : i32
    %c0_i32_0 = arith.constant 0 : i32
    %c0_i32_1 = arith.constant 0 : i32
    return %c0_i32, %c0_i32_0 : i32, i32
  }
  func.func @transform_3(%arg0: i32) -> (i32, i32) {
    %c0_i32 = arith.constant 0 : i32
    %c0_i32_0 = arith.constant 0 : i32
    return %arg0, %c0_i32 : i32, i32
  }
}

</mosaic_0001>

<bundles_post_ra>
// kernel: tpu_custom_call.1
= control target key start
LH: loop header
LB: loop body
LE: loop exit
PB: predicated region body
PF: predicated region fallthrough
CT: control target
= control target key end

     0   :  { %8 = vsyncpa [#allocation3], 0  ;;  %s237_s0 = inlined_call_operand.hbm [shape: f32[16,128], index: 0, kind: input, shape index: {}]   ;;  %s238_s1 = inlined_call_operand.vmem [shape: f32[1,128], index: 1, kind: input, shape index: {}]   ;;  %s239_s2 = inlined_call_operand.vmem [shape: f32[1,128], index: 2, kind: input, shape index: {}]   ;;  %s240_s3 = inlined_call_operand.hbm [shape: f32[16,128], index: 3, kind: output, shape index: {}]  }
   0x1   :  { %9 = vsyncpa [#allocation4], 0  ;;  %s173_s12 = smov [#allocation2]   ;;  %s125_s16 = scalar_lea.hbm %s237_s0, 256 }
   0x2   :  { %s15_s13 = sshll.u32 %s173_s12, 4  ;;  %p126_p0 = scmp.ne.s32.totalorder %s237_s0, %s125_s16  ;;  %s16_s13 = int_to_ptr.vmem [resolvable:$true] %s15_s13 }
   0x3   :  { %p129_p1 = scmp.lt.u32.totalorder %s125_s16, %s237_s0 }
   0x5   :  { %p131_p2 = pnand %p129_p1, %p126_p0 }
   0x7   :  { %134 = shalt.err (!%p131_p2)
}
   0x8   :  { %s135_s21 = scalar_lea.vmem %s16_s13, 256  ;;  %p140_p4 = scmp.lt.s32.totalorder %s16_s13, %s16_s13 }
   0x9   :  { %p136_p3 = scmp.ne.s32.totalorder %s16_s13, %s135_s21  ;;  %p141_p5 = scmp.lt.s32.totalorder %s135_s21, %s135_s21 }
   0xb   :  { %p142_p6 = por %p141_p5, %p140_p4 }
   0xd   :  { %p143_p7 = pnand %p142_p6, %p136_p3 }
   0xf   :  { %146 = shalt.err (!%p143_p7)
}
  0x10   :  { %s174_s22 = smov 128   ;;  %s175_s23 = smov 8  }
  0x11   :  { %21 = dma.hbm_to_vmem [thread:$0]  %s237_s0, 256, %s16_s13, [#allocation3], %s174_s22, %s174_s22, %s175_s23  }
  0x12   :  { %169 = dma.done.wait [#allocation3], 256  }
  0x13   :  { %170 = vsyncadd [#allocation3], 4294967040  ;;  %v31_v0 = vlaneseq  ;;  %v29_v2 = vld [vmem:[#allocation2] sm:$0xff]  ;;  %v30_v3 = vld [vmem:[#allocation2 + $0x8] sm:$0xff]  ;;  %s176_s29 = smov [#allocation5]  }
  0x14   :  { %v111_v33 = vld [vmem:[%s238_s1] ss:$0 sm:$0xff]  ;;  %s99_s30 = sshll.u32 %s176_s29, 4  ;;  %s100_s30 = int_to_ptr.vmem [resolvable:$true] %s99_s30 }
  0x15   :  { %v32_v1 = vand.u32 127, %v31_v0  ;;  %v112_v35 = vld [vmem:[%s239_s2] ss:$0 sm:$0xff]  ;;  %s147_s4 = scalar_lea.vmem %s100_s30, 256  ;;  %p152_p9 = scmp.lt.s32.totalorder %s100_s30, %s100_s30 }
  0x16   :  { %p148_p8 = scmp.ne.s32.totalorder %s100_s30, %s147_s4  ;;  %p153_p10 = scmp.lt.s32.totalorder %s147_s4, %s147_s4 }
  0x17   :  { %vm33_vm0 = vcmp.lt.s32.totalorder %v32_v1, 32 }
  0x18   :  { %v34_v4 = vsel %vm33_vm0, %v29_v2, 0.0  ;;  %v35_v5 = vsel %vm33_vm0, %v30_v3, 0.0  ;;  %p154_p11 = por %p153_p10, %p152_p9 }
  0x19   :  { %36 = vadd.xlane.f32.xlu0 %v34_v4 }
  0x1a   :  { %p155_p12 = pnand %p154_p11, %p148_p8 }
  0x1d   :  { %38 = vadd.xlane.f32.xlu0 %v35_v5 }
  0xa6   :  { %v37_v6 = vpop.xlane.xlu0 %36 }
  0xa7   :  { %v40_v7 = vmul.f32 0.03125, %v37_v6 }
  0xa9   :  { %v42_v8 = vsub.f32 %v34_v4, %v40_v7 }
  0xaa   :  { %v39_v9 = vpop.xlane.xlu0 %38 }
  0xab   :  { %v41_v10 = vmul.f32 0.03125, %v39_v9  ;;  %v44_v11 = vsel %vm33_vm0, %v42_v8, 0.0 }
  0xac   :  { %v46_v12 = vmul.f32 %v44_v11, %v44_v11 }
  0xad   :  { %v43_v13 = vsub.f32 %v35_v5, %v41_v10 }
  0xae   :  { %48 = vadd.xlane.f32.xlu1 %v46_v12 }
  0xaf   :  { %v45_v14 = vsel %vm33_vm0, %v43_v13, 0.0 }
  0xb0   :  { %v47_v15 = vmul.f32 %v45_v14, %v45_v14 }
  0xb2   :  { %50 = vadd.xlane.f32.xlu1 %v47_v15 }
 0x13b   :  { %v49_v16 = vpop.xlane.xlu1 %48 }
 0x13c   :  { %v52_v17 = vmul.f32 0.032258064, %v49_v16 }
 0x13e   :  { %117 = vrsqrt.f32 %v52_v17  ;;  %vm56_vm1 = vcmp.eq.f32.partialorder %v52_v17, inf  ;;  %v59_v22 = vand.u32 2147483648, %v52_v17  ;;  %vm58_vm2 = vcmp.eq.f32.partialorder %v52_v17, 0.0 }
 0x13f   :  { %v51_v18 = vpop.xlane.xlu1 %50 }
 0x140   :  { %v53_v19 = vmul.f32 0.032258064, %v51_v18 }
 0x142   :  { %119 = vrsqrt.f32 %v53_v19  ;;  %vm63_vm3 = vcmp.eq.f32.partialorder %v53_v19, inf  ;;  %v66_v28 = vand.u32 2147483648, %v53_v19  ;;  %vm65_vm4 = vcmp.eq.f32.partialorder %v53_v19, 0.0 }
 0x148   :  { %v118_v20 = vpop.eup %117 }
 0x149   :  { %v55_v21 = vmul.f32 %v118_v20, %v52_v17 }
 0x14b   :  { %v57_v23 = vsel %vm56_vm1, %v52_v17, %v55_v21 }
 0x14c   :  { %v120_v24 = vpop.eup %119  ;;  %v60_v25 = vsel %vm58_vm2, %v59_v22, %v57_v23 }
 0x14d   :  { %v62_v26 = vmul.f32 %v120_v24, %v53_v19  ;;  %v68_v27 = vadd.f32 1e-06, %v60_v25 }
 0x14f   :  { %v64_v29 = vsel %vm63_vm3, %v53_v19, %v62_v26  ;;  %121 = vrcp.f32 %v68_v27 }
 0x150   :  { %v67_v30 = vsel %vm65_vm4, %v66_v28, %v64_v29 }
 0x151   :  { %v69_v31 = vadd.f32 1e-06, %v67_v30 }
 0x153   :  { %123 = vrcp.f32 %v69_v31 }
 0x159   :  { %v122_v32 = vpop.eup %121 }
 0x15a   :  { %v74_v34 = vmul.f32 %v122_v32, %v44_v11 }
 0x15c   :  { %v82_v36 = vmul.f32 %v111_v33, %v74_v34 }
 0x15d   :  { %v124_v37 = vpop.eup %123 }
 0x15e   :  { %v75_v38 = vmul.f32 %v124_v37, %v45_v14  ;;  %v90_v39 = vadd.f32 %v112_v35, %v82_v36 }
 0x160   :  { %v83_v40 = vmul.f32 %v111_v33, %v75_v38  ;;  %92 = vst [vmem:[#allocation5] sm:$0xff] %v90_v39 }
 0x162   :  { %v91_v41 = vadd.f32 %v112_v35, %v83_v40 }
 0x164   :  { %93 = vst [vmem:[#allocation5 + $0x8] sm:$0xff] %v91_v41 }
 0x165   :  { %158 = shalt.err (!%p155_p12)
}
 0x166   :  { %s159_s5 = scalar_lea.hbm %s240_s3, 256 }
 0x167   :  { %p160_p13 = scmp.ne.s32.totalorder %s240_s3, %s159_s5  ;;  %p163_p0 = scmp.lt.u32.totalorder %s159_s5, %s240_s3 }
 0x169   :  { %p165_p1 = pnand %p163_p0, %p160_p13 }
 0x16b   :  { %168 = shalt.err (!%p165_p1)
}
 0x16c   :  { %105 = dma.vmem_to_hbm [thread:$0]  %s100_s30, 256, %s240_s3, [#allocation4], %s174_s22, %s174_s22, %s175_s23  }
 0x16d   :  { %171 = dma.done.wait [#allocation4], 256  }
 0x16e   :  { %172 = vsyncadd [#allocation4], 4294967040 }
 0x16f   :  { %109 = vsyncpa [#allocation3], 1 }
 0x170   :  { %110 = vsyncpa [#allocation4], 1 }

</bundles_post_ra>
